<compile_context>
chip_gen: v7x
topology: tpu7x:2x2x1
jax: 0.10.0
libtpu: 0.0.40
codegen_flags: <defaults>
</compile_context>

<pallas_src>
import functools

import jax
import jax.numpy as jnp
import numpy as np
from jax.experimental import pallas as pl
from jax.experimental.pallas import tpu as pltpu

HIDDEN = 256      # hard-coded in the PyTorch module (fc1/fc2/fc3 width)
HEAD_PAD = 128    # heads are packed + zero-padded to a full lane width


def _multihead_kernel(sa_ref, w1_ref, b123_ref, w23_ref, wh_ref, bh_ref, out_ref):
    """Shared trunk + fused heads, one grid step.

    sa_ref   : (B, in_dim)
    w1_ref   : (in_dim, HIDDEN)
    b123_ref : (3, HIDDEN)            rows = fc1/fc2/fc3 biases
    w23_ref  : (2, HIDDEN, HIDDEN)    [fc2.W, fc3.W]
    wh_ref   : (HIDDEN, HEAD_PAD)     all head weights, zero padded
    bh_ref   : (1, HEAD_PAD)          all head biases, zero padded
    out_ref  : (B, HEAD_PAD)          lane-dense output slab
    """
    sa = sa_ref[...]
    b123 = b123_ref[...]

    h = jnp.dot(sa, w1_ref[...], preferred_element_type=jnp.float32) + b123[0:1, :]
    h = jnp.maximum(h, 0.0)
    h = jnp.dot(h, w23_ref[0], preferred_element_type=jnp.float32) + b123[1:2, :]
    h = jnp.maximum(h, 0.0)
    h = jnp.dot(h, w23_ref[1], preferred_element_type=jnp.float32) + b123[2:3, :]
    h = jnp.maximum(h, 0.0)

    out = jnp.dot(h, wh_ref[...], preferred_element_type=jnp.float32) + bh_ref[...]
    out_ref[...] = out.astype(out_ref.dtype)


def _heads_apply(params, x, actions, max_action, head_w, head_b):
    """Run trunk + one packed set of heads. Returns (num_heads, B, 1)."""
    sa = jnp.concatenate([x, actions / max_action], axis=1).astype(jnp.float32)
    B, in_dim = sa.shape
    num_heads = head_w.shape[1]
    assert num_heads <= HEAD_PAD

    # Pack parameters into a small number of DMA-friendly buffers.
    b123 = jnp.stack([params["b1"], params["b2"], params["b3"]], axis=0)   # (3, H)
    w23 = jnp.stack([params["w2"], params["w3"]], axis=0)                  # (2, H, H)
    wh = jnp.pad(head_w, ((0, 0), (0, HEAD_PAD - num_heads)))              # (H, 128)
    bh = jnp.pad(head_b[None, :], ((0, 0), (0, HEAD_PAD - num_heads)))     # (1, 128)

    flops = 2 * B * (in_dim * HIDDEN + 2 * HIDDEN * HIDDEN + HIDDEN * HEAD_PAD)
    bytes_accessed = 4 * (sa.size + params["w1"].size + b123.size + w23.size
                          + wh.size + bh.size + B * HEAD_PAD)

    out = pl.pallas_call(
        _multihead_kernel,
        grid=(1,),
        in_specs=[
            pl.BlockSpec((B, in_dim), lambda i: (0, 0)),
            pl.BlockSpec((in_dim, HIDDEN), lambda i: (0, 0)),
            pl.BlockSpec((3, HIDDEN), lambda i: (0, 0)),
            pl.BlockSpec((2, HIDDEN, HIDDEN), lambda i: (0, 0, 0)),
            pl.BlockSpec((HIDDEN, HEAD_PAD), lambda i: (0, 0)),
            pl.BlockSpec((1, HEAD_PAD), lambda i: (0, 0)),
        ],
        out_specs=pl.BlockSpec((B, HEAD_PAD), lambda i: (0, 0)),
        out_shape=jax.ShapeDtypeStruct((B, HEAD_PAD), jnp.float32),
        compiler_params=pltpu.CompilerParams(
            dimension_semantics=("arbitrary",)),
        cost_estimate=pl.CostEstimate(
            flops=flops, transcendentals=0, bytes_accessed=bytes_accessed),
    )(sa, params["w1"], b123, w23, wh, bh)

    # (B, HEAD_PAD) -> slice real heads -> (num_heads, B, 1) to match
    # torch.stack([head_i(h) for i in heads]) with each head output (B, 1).
    return jnp.transpose(out[:, :num_heads])[:, :, None]


def multihead_critic_forward(params, x, actions, max_action):
    return _heads_apply(params, x, actions, max_action, params["wq"], params["bq"])


def multihead_critic_predict_forward(params, x, actions, max_action):
    return _heads_apply(params, x, actions, max_action, params["wf"], params["bf"])


def multihead_critic_predict_reward(params, x, actions, max_action):
    return _heads_apply(params, x, actions, max_action, params["wr"], params["br"])


def init_params(key, num_heads, in_dim):
    """Deterministic nn.Linear-style init (U[-1/sqrt(fan_in), 1/sqrt(fan_in)])."""
    def linear(k, fan_in, fan_out):
        k1, k2 = jax.random.split(k)
        bound = 1.0 / np.sqrt(fan_in)
        w = jax.random.uniform(k1, (fan_in, fan_out), jnp.float32, -bound, bound)
        b = jax.random.uniform(k2, (fan_out,), jnp.float32, -bound, bound)
        return w, b

    keys = jax.random.split(key, 6)
    w1, b1 = linear(keys[0], in_dim, HIDDEN)
    w2, b2 = linear(keys[1], HIDDEN, HIDDEN)
    w3, b3 = linear(keys[2], HIDDEN, HIDDEN)
    wq, bq = linear(keys[3], HIDDEN, num_heads)   # q_out{i} heads, stacked on out dim
    wf, bf = linear(keys[4], HIDDEN, num_heads)   # q_forward{i} heads
    wr, br = linear(keys[5], HIDDEN, num_heads)   # q_reward{i} heads
    return dict(w1=w1, b1=b1, w2=w2, b2=b2, w3=w3, b3=b3,
                wq=wq, bq=bq, wf=wf, bf=bf, wr=wr, br=br)


def _reference(params, x, actions, max_action, head_w, head_b):
    """Pure-JAX reference for correctness checking."""
    sa = jnp.concatenate([x, actions / max_action], axis=1)
    h = jax.nn.relu(sa @ params["w1"] + params["b1"])
    h = jax.nn.relu(h @ params["w2"] + params["b2"])
    h = jax.nn.relu(h @ params["w3"] + params["b3"])
    out = h @ head_w + head_b                      # (B, num_heads)
    return jnp.transpose(out)[:, :, None]          # (num_heads, B, 1)


if __name__ == "__main__":
    # Small, forward-consistent sizes (args.obs_dim/goal_dim/action_dim).
    obs_dim, goal_dim, action_dim = 10, 5, 4
    num_heads = 3            # args.n_internal_critics
    batch = 8
    max_action = 1.0
    in_dim = obs_dim + goal_dim + action_dim   # 19

    key = jax.random.PRNGKey(0)
    kp, kx, ka = jax.random.split(key, 3)
    params = init_params(kp, num_heads, in_dim)
    x = jax.random.normal(kx, (batch, obs_dim + goal_dim), jnp.float32)
    actions = jax.random.normal(ka, (batch, action_dim), jnp.float32)

    fwd = jax.jit(functools.partial(multihead_critic_forward, max_action=max_action))
    q = fwd(params, x, actions)
    jax.block_until_ready(q)

    q_ref = _reference(params, x, actions, max_action, params["wq"], params["bq"])
    np.testing.assert_allclose(np.asarray(q), np.asarray(q_ref),
                               rtol=1e-4, atol=1e-4)
    assert q.shape == (num_heads, batch, 1)

    # Exercise the other two head families (same kernel, different packed heads).
    pf = multihead_critic_predict_forward(params, x, actions, max_action)
    pr = multihead_critic_predict_reward(params, x, actions, max_action)
    jax.block_until_ready((pf, pr))
    np.testing.assert_allclose(
        np.asarray(pf),
        np.asarray(_reference(params, x, actions, max_action, params["wf"], params["bf"])),
        rtol=1e-4, atol=1e-4)
    np.testing.assert_allclose(
        np.asarray(pr),
        np.asarray(_reference(params, x, actions, max_action, params["wr"], params["br"])),
        rtol=1e-4, atol=1e-4)

    # TODO(synk): training (Adam optimizer) is host-side PyTorch glue and is not kernelized.
    print("KERNEL_OK")
</pallas_src>

<mosaic_0001>
module attributes {stable_mosaic.version = 11 : i64} {
  func.func @_multihead_kernel(%arg0: i32, %arg1: memref<8x19xf32, #tpu.memory_space<vmem>>, %arg2: memref<19x256xf32, #tpu.memory_space<vmem>>, %arg3: memref<3x256xf32, #tpu.memory_space<vmem>>, %arg4: memref<2x256x256xf32, #tpu.memory_space<vmem>>, %arg5: memref<256x128xf32, #tpu.memory_space<vmem>>, %arg6: memref<1x128xf32, #tpu.memory_space<vmem>>, %arg7: memref<8x128xf32, #tpu.memory_space<vmem>>) attributes {dimension_semantics = [#tpu.dimension_semantics<arbitrary>], iteration_bounds = array<i64: 1>, scalar_prefetch = 0 : i64, scratch_operands = 0 : i64, tpu.core_type = #tpu.core_type<tc>, window_params = [{pipeline_mode = #tpu.pipeline_mode<synchronous>, transform_indices = @transform_0, window_bounds = array<i64: 8, 19>}, {pipeline_mode = #tpu.pipeline_mode<synchronous>, transform_indices = @transform_1, window_bounds = array<i64: 19, 256>}, {pipeline_mode = #tpu.pipeline_mode<synchronous>, transform_indices = @transform_2, window_bounds = array<i64: 3, 256>}, {pipeline_mode = #tpu.pipeline_mode<synchronous>, transform_indices = @transform_3, window_bounds = array<i64: 2, 256, 256>}, {pipeline_mode = #tpu.pipeline_mode<synchronous>, transform_indices = @transform_4, window_bounds = array<i64: 256, 128>}, {pipeline_mode = #tpu.pipeline_mode<synchronous>, transform_indices = @transform_5, window_bounds = array<i64: 1, 128>}, {pipeline_mode = #tpu.pipeline_mode<synchronous>, transform_indices = @transform_6, window_bounds = array<i64: 8, 128>}]} {
    %c0 = arith.constant 0 : index
    %c0_0 = arith.constant 0 : index
    %0 = vector.load %arg1[%c0, %c0_0] : memref<8x19xf32, #tpu.memory_space<vmem>>, vector<8x19xf32>
    %c0_1 = arith.constant 0 : index
    %c0_2 = arith.constant 0 : index
    %1 = vector.load %arg3[%c0_1, %c0_2] : memref<3x256xf32, #tpu.memory_space<vmem>>, vector<3x256xf32>
    %c0_3 = arith.constant 0 : index
    %c0_4 = arith.constant 0 : index
    %2 = vector.load %arg2[%c0_3, %c0_4] : memref<19x256xf32, #tpu.memory_space<vmem>>, vector<19x256xf32>
    %cst = arith.constant dense<0.000000e+00> : vector<8x256xf32>
    %3 = tpu.matmul %0, %2, %cst {dimension_numbers = #tpu.dot_dimension_numbers<[1], [0], [0], [1], [0, 0, 1, 1], [], []>} : vector<8x19xf32>, vector<19x256xf32>, vector<8x256xf32> -> vector<8x256xf32>
    %4 = vector.extract_strided_slice %1 {offsets = [0, 0], sizes = [1, 256], strides = [1, 1]} : vector<3x256xf32> to vector<1x256xf32>
    %5 = vector.broadcast %4 : vector<1x256xf32> to vector<8x256xf32>
    %6 = arith.addf %3, %5 : vector<8x256xf32>
    %cst_5 = arith.constant 0.000000e+00 : f32
    %7 = vector.broadcast %cst_5 : f32 to vector<8x256xf32>
    %8 = arith.maximumf %6, %7 : vector<8x256xf32>
    %c0_6 = arith.constant 0 : index
    %c0_7 = arith.constant 0 : index
    %c0_8 = arith.constant 0 : index
    %9 = vector.load %arg4[%c0_6, %c0_7, %c0_8] : memref<2x256x256xf32, #tpu.memory_space<vmem>>, vector<1x256x256xf32>
    %10 = vector.shape_cast %9 : vector<1x256x256xf32> to vector<256x256xf32>
    %cst_9 = arith.constant dense<0.000000e+00> : vector<8x256xf32>
    %11 = tpu.matmul %8, %10, %cst_9 {dimension_numbers = #tpu.dot_dimension_numbers<[1], [0], [0], [1], [0, 0, 1, 1], [], []>} : vector<8x256xf32>, vector<256x256xf32>, vector<8x256xf32> -> vector<8x256xf32>
    %12 = vector.extract_strided_slice %1 {offsets = [1, 0], sizes = [1, 256], strides = [1, 1]} : vector<3x256xf32> to vector<1x256xf32>
    %13 = vector.broadcast %12 : vector<1x256xf32> to vector<8x256xf32>
    %14 = arith.addf %11, %13 : vector<8x256xf32>
    %cst_10 = arith.constant 0.000000e+00 : f32
    %15 = vector.broadcast %cst_10 : f32 to vector<8x256xf32>
    %16 = arith.maximumf %14, %15 : vector<8x256xf32>
    %c1 = arith.constant 1 : index
    %c0_11 = arith.constant 0 : index
    %c0_12 = arith.constant 0 : index
    %17 = vector.load %arg4[%c1, %c0_11, %c0_12] : memref<2x256x256xf32, #tpu.memory_space<vmem>>, vector<1x256x256xf32>
    %18 = vector.shape_cast %17 : vector<1x256x256xf32> to vector<256x256xf32>
    %cst_13 = arith.constant dense<0.000000e+00> : vector<8x256xf32>
    %19 = tpu.matmul %16, %18, %cst_13 {dimension_numbers = #tpu.dot_dimension_numbers<[1], [0], [0], [1], [0, 0, 1, 1], [], []>} : vector<8x256xf32>, vector<256x256xf32>, vector<8x256xf32> -> vector<8x256xf32>
    %20 = vector.extract_strided_slice %1 {offsets = [2, 0], sizes = [1, 256], strides = [1, 1]} : vector<3x256xf32> to vector<1x256xf32>
    %21 = vector.broadcast %20 : vector<1x256xf32> to vector<8x256xf32>
    %22 = arith.addf %19, %21 : vector<8x256xf32>
    %cst_14 = arith.constant 0.000000e+00 : f32
    %23 = vector.broadcast %cst_14 : f32 to vector<8x256xf32>
    %24 = arith.maximumf %22, %23 : vector<8x256xf32>
    %c0_15 = arith.constant 0 : index
    %c0_16 = arith.constant 0 : index
    %25 = vector.load %arg5[%c0_15, %c0_16] : memref<256x128xf32, #tpu.memory_space<vmem>>, vector<256x128xf32>
    %cst_17 = arith.constant dense<0.000000e+00> : vector<8x128xf32>
    %26 = tpu.matmul %24, %25, %cst_17 {dimension_numbers = #tpu.dot_dimension_numbers<[1], [0], [0], [1], [0, 0, 1, 1], [], []>} : vector<8x256xf32>, vector<256x128xf32>, vector<8x128xf32> -> vector<8x128xf32>
    %c0_18 = arith.constant 0 : index
    %c0_19 = arith.constant 0 : index
    %27 = vector.load %arg6[%c0_18, %c0_19] : memref<1x128xf32, #tpu.memory_space<vmem>>, vector<1x128xf32>
    %28 = vector.broadcast %27 : vector<1x128xf32> to vector<8x128xf32>
    %29 = arith.addf %26, %28 : vector<8x128xf32>
    %c0_20 = arith.constant 0 : index
    %c0_21 = arith.constant 0 : index
    %30 = vector.load %arg7[%c0_20, %c0_21] : memref<8x128xf32, #tpu.memory_space<vmem>>, vector<8x128xf32>
    tpu.vector_store %arg7[%c0_20, %c0_21], %29 {strides = array<i32>} : memref<8x128xf32, #tpu.memory_space<vmem>>, vector<8x128xf32>,
    return
  }
  func.func @transform_0(%arg0: i32) -> (i32, i32) {
    %c0_i32 = arith.constant 0 : i32
    %c0_i32_0 = arith.constant 0 : i32
    %c0_i32_1 = arith.constant 0 : i32
    return %c0_i32, %c0_i32_0 : i32, i32
  }
  func.func @transform_1(%arg0: i32) -> (i32, i32) {
    %c0_i32 = arith.constant 0 : i32
    %c0_i32_0 = arith.constant 0 : i32
    %c0_i32_1 = arith.constant 0 : i32
    return %c0_i32, %c0_i32_0 : i32, i32
  }
  func.func @transform_2(%arg0: i32) -> (i32, i32) {
    %c0_i32 = arith.constant 0 : i32
    %c0_i32_0 = arith.constant 0 : i32
    %c0_i32_1 = arith.constant 0 : i32
    return %c0_i32, %c0_i32_0 : i32, i32
  }
  func.func @transform_3(%arg0: i32) -> (i32, i32, i32) {
    %c0_i32 = arith.constant 0 : i32
    %c0_i32_0 = arith.constant 0 : i32
    %c0_i32_1 = arith.constant 0 : i32
    %c0_i32_2 = arith.constant 0 : i32
    return %c0_i32, %c0_i32_0, %c0_i32_1 : i32, i32, i32
  }
  func.func @transform_4(%arg0: i32) -> (i32, i32) {
    %c0_i32 = arith.constant 0 : i32
    %c0_i32_0 = arith.constant 0 : i32
    %c0_i32_1 = arith.constant 0 : i32
    return %c0_i32, %c0_i32_0 : i32, i32
  }
  func.func @transform_5(%arg0: i32) -> (i32, i32) {
    %c0_i32 = arith.constant 0 : i32
    %c0_i32_0 = arith.constant 0 : i32
    %c0_i32_1 = arith.constant 0 : i32
    return %c0_i32, %c0_i32_0 : i32, i32
  }
  func.func @transform_6(%arg0: i32) -> (i32, i32) {
    %c0_i32 = arith.constant 0 : i32
    %c0_i32_0 = arith.constant 0 : i32
    %c0_i32_1 = arith.constant 0 : i32
    return %c0_i32, %c0_i32_0 : i32, i32
  }
}

</mosaic_0001>

<bundles_post_ra>
// kernel: multihead_critic_forward.1
= control target key start
LH: loop header
LB: loop body
LE: loop exit
PB: predicated region body
PF: predicated region fallthrough
CT: control target
= control target key end

     0   :  { %v827_v3 = vmov 0.0   ;;  %vm54_vm0 = vcmask 1042432   ;;  %vm50_vm1 = vcmask 154624   ;;  %s1391_s1 = inlined_call_operand.vmem [shape: f32[19,256], index: 1, kind: input, shape index: {}]   ;;  %s1392_s3 = inlined_call_operand.vmem [shape: f32[2,256,256], index: 3, kind: input, shape index: {}]   ;;  %s1393_s0 = inlined_call_operand.vmem [shape: f32[8,19], index: 0, kind: input, shape index: {}]   ;;  %s1394_s2 = inlined_call_operand.vmem [shape: f32[3,256], index: 2, kind: input, shape index: {}]   ;;  %s1395_s4 = inlined_call_operand.vmem [shape: f32[256,128], index: 4, kind: input, shape index: {}]   ;;  %s1396_s5 = inlined_call_operand.vmem [shape: f32[1,128], index: 5, kind: input, shape index: {}]   ;;  %s1397_s6 = inlined_call_operand.vmem [shape: f32[8,128], index: 6, kind: output, shape index: {}]  }
   0x1   :  { %v26_v0 = vld [vmem:[%s1391_s1 + $0x8] sm:$0xff]  ;;  %v28_v1 = vld [vmem:[%s1391_s1 + $0x18] sm:$0xff]  ;;  %v25_v2 = vld [vmem:[%s1391_s1] sm:$0xff]  ;;  %125 = vmatprep.mubr.f32.mxu0 %v827_v3 }
   0x2   :  { %v662_v4 = vpack.c.bf16 %v28_v1, %v26_v0  ;;  %v27_v5 = vld [vmem:[%s1391_s1 + $0x10] sm:$0xff]  ;;  %v30_v7 = vld [vmem:[%s1391_s1 + $0x28] sm:$0x7]  ;;  %v137_v9 = vld [vmem:[%s1392_s3 + $0x18] sm:$0xff] }
   0x3   :  { %v664_v6 = vpack.c.bf16 %v27_v5, %v25_v2  ;;  %v135_v8 = vld [vmem:[%s1392_s3 + $0x8] sm:$0xff]  ;;  %v134_v11 = vld [vmem:[%s1392_s3] sm:$0xff]  ;;  %v136_v12 = vld [vmem:[%s1392_s3 + $0x10] sm:$0xff] }
   0x4   :  { %663 = vmatprep.subr.bf16.mxu0 %v662_v4  ;;  %v666_v10 = vpack.c.bf16 %v137_v9, %v135_v8  ;;  %v139_v13 = vld [vmem:[%s1392_s3 + $0x28] sm:$0xff]  ;;  %v668_v14 = vpack.c.bf16 %v136_v12, %v134_v11  ;;  %v141_v15 = vld [vmem:[%s1392_s3 + $0x38] sm:$0xff]  ;;  %v138_v16 = vld [vmem:[%s1392_s3 + $0x20] sm:$0xff] }
   0x5   :  { %665 = vmatpush1.bf16.msra.mxu0 %v664_v6  ;;  %v140_v17 = vld [vmem:[%s1392_s3 + $0x30] sm:$0xff]  ;;  %v29_v18 = vld [vmem:[%s1391_s1 + $0x20] sm:$0x7]  ;;  %v670_v19 = vpack.c.bf16 %v141_v15, %v139_v13  ;;  %v143_v20 = vld [vmem:[%s1392_s3 + $0x48] sm:$0xff] }
   0x6   :  { %559 = vmatprep.subr.msk.mxu0 %vm54_vm0, %v30_v7  ;;  %667 = vmatprep.subr.bf16.mxu1 %v666_v10  ;;  %v145_v21 = vld [vmem:[%s1392_s3 + $0x58] sm:$0xff]  ;;  %v23_v22 = vld [vmem:[%s1393_s0] sm:$0xff]  ;;  %v672_v23 = vpack.c.bf16 %v140_v17, %v138_v16  ;;  %v144_v26 = vld [vmem:[%s1392_s3 + $0x50] sm:$0xff] }
   0x7   :  { %669 = vmatpush1.bf16.msra.mxu1 %v668_v14  ;;  %v674_v24 = vpack.c.bf16 %v145_v21, %v143_v20  ;;  %v142_v25 = vld [vmem:[%s1392_s3 + $0x40] sm:$0xff]  ;;  %v147_v27 = vld [vmem:[%s1392_s3 + $0x68] sm:$0xff]  ;;  %v149_v28 = vld [vmem:[%s1392_s3 + $0x78] sm:$0xff] }
   0x8   :  { %671 = vmatprep.subr.bf16.mxu1 %v670_v19  ;;  %v676_v29 = vpack.c.bf16 %v144_v26, %v142_v25  ;;  %v678_v30 = vpack.c.bf16 %v149_v28, %v147_v27  ;;  %v146_v31 = vld [vmem:[%s1392_s3 + $0x60] sm:$0xff]  ;;  %v148_v32 = vld [vmem:[%s1392_s3 + $0x70] sm:$0xff]  ;;  %v151_v33 = vld [vmem:[%s1392_s3 + $0x88] sm:$0xff] }
   0x9   :  { %560 = vmatpush1.msk.msra.mxu0 %vm54_vm0, %v29_v18  ;;  %v153_v34 = vld [vmem:[%s1392_s3 + $0x98] sm:$0xff]  ;;  %v680_v35 = vpack.c.bf16 %v148_v32, %v146_v31  ;;  %v150_v37 = vld [vmem:[%s1392_s3 + $0x80] sm:$0xff]  ;;  %v152_v38 = vld [vmem:[%s1392_s3 + $0x90] sm:$0xff] }
   0xa   :  { %561 = vmatmul.mubr.msk.f32.vlgmr.msra.gmra.mrb[0].mxu0 %vm50_vm1, %v23_v22  ;;  %v682_v36 = vpack.c.bf16 %v153_v34, %v151_v33  ;;  %v155_v39 = vld [vmem:[%s1392_s3 + $0xa8] sm:$0xff]  ;;  %v157_v40 = vld [vmem:[%s1392_s3 + $0xb8] sm:$0xff]  ;;  %v684_v41 = vpack.c.bf16 %v152_v38, %v150_v37  ;;  %v154_v43 = vld [vmem:[%s1392_s3 + $0xa0] sm:$0xff] }
   0xb   :  { %673 = vmatpush1.bf16.msra.mxu1 %v672_v23  ;;  %v686_v42 = vpack.c.bf16 %v157_v40, %v155_v39  ;;  %v156_v44 = vld [vmem:[%s1392_s3 + $0xb0] sm:$0xff]  ;;  %v159_v45 = vld [vmem:[%s1392_s3 + $0xc8] sm:$0xff]  ;;  %v161_v46 = vld [vmem:[%s1392_s3 + $0xd8] sm:$0xff] }
   0xc   :  { %675 = vmatprep.subr.bf16.mxu1 %v674_v24  ;;  %v688_v47 = vpack.c.bf16 %v156_v44, %v154_v43  ;;  %v690_v48 = vpack.c.bf16 %v161_v46, %v159_v45  ;;  %v158_v49 = vld [vmem:[%s1392_s3 + $0xc0] sm:$0xff]  ;;  %v160_v50 = vld [vmem:[%s1392_s3 + $0xd0] sm:$0xff]  ;;  %v163_v51 = vld [vmem:[%s1392_s3 + $0xe8] sm:$0xff] }
   0xd   :  { %v165_v52 = vld [vmem:[%s1392_s3 + $0xf8] sm:$0xff]  ;;  %v692_v53 = vpack.c.bf16 %v160_v50, %v158_v49  ;;  %v162_v55 = vld [vmem:[%s1392_s3 + $0xe0] sm:$0xff]  ;;  %v164_v56 = vld [vmem:[%s1392_s3 + $0xf0] sm:$0xff] }
   0xe   :  { %v694_v54 = vpack.c.bf16 %v165_v52, %v163_v51  ;;  %v167_v57 = vld [vmem:[%s1392_s3 + $0x108] sm:$0xff]  ;;  %v169_v58 = vld [vmem:[%s1392_s3 + $0x118] sm:$0xff]  ;;  %v696_v59 = vpack.c.bf16 %v164_v56, %v162_v55  ;;  %v166_v61 = vld [vmem:[%s1392_s3 + $0x100] sm:$0xff] }
   0xf   :  { %677 = vmatpush1.bf16.msra.mxu1 %v676_v29  ;;  %v698_v60 = vpack.c.bf16 %v169_v58, %v167_v57  ;;  %v168_v62 = vld [vmem:[%s1392_s3 + $0x110] sm:$0xff]  ;;  %v171_v63 = vld [vmem:[%s1392_s3 + $0x128] sm:$0xff]  ;;  %v173_v0 = vld [vmem:[%s1392_s3 + $0x138] sm:$0xff] }
  0x10   :  { %679 = vmatprep.subr.bf16.mxu1 %v678_v30  ;;  %v700_v1 = vpack.c.bf16 %v168_v62, %v166_v61  ;;  %v702_v2 = vpack.c.bf16 %v173_v0, %v171_v63  ;;  %v170_v3 = vld [vmem:[%s1392_s3 + $0x120] sm:$0xff]  ;;  %v172_v4 = vld [vmem:[%s1392_s3 + $0x130] sm:$0xff]  ;;  %v175_v5 = vld [vmem:[%s1392_s3 + $0x148] sm:$0xff] }
  0x11   :  { %v177_v6 = vld [vmem:[%s1392_s3 + $0x158] sm:$0xff]  ;;  %v704_v7 = vpack.c.bf16 %v172_v4, %v170_v3  ;;  %v174_v9 = vld [vmem:[%s1392_s3 + $0x140] sm:$0xff]  ;;  %v176_v10 = vld [vmem:[%s1392_s3 + $0x150] sm:$0xff] }
  0x12   :  { %v706_v8 = vpack.c.bf16 %v177_v6, %v175_v5  ;;  %v179_v11 = vld [vmem:[%s1392_s3 + $0x168] sm:$0xff]  ;;  %v181_v12 = vld [vmem:[%s1392_s3 + $0x178] sm:$0xff]  ;;  %v708_v13 = vpack.c.bf16 %v176_v10, %v174_v9  ;;  %v178_v15 = vld [vmem:[%s1392_s3 + $0x160] sm:$0xff] }
  0x13   :  { %681 = vmatpush1.bf16.msra.mxu1 %v680_v35  ;;  %v710_v14 = vpack.c.bf16 %v181_v12, %v179_v11  ;;  %v180_v16 = vld [vmem:[%s1392_s3 + $0x170] sm:$0xff]  ;;  %v183_v17 = vld [vmem:[%s1392_s3 + $0x188] sm:$0xff]  ;;  %v185_v18 = vld [vmem:[%s1392_s3 + $0x198] sm:$0xff] }
  0x14   :  { %683 = vmatprep.subr.bf16.mxu1 %v682_v36  ;;  %v712_v19 = vpack.c.bf16 %v180_v16, %v178_v15  ;;  %v714_v20 = vpack.c.bf16 %v185_v18, %v183_v17  ;;  %v182_v21 = vld [vmem:[%s1392_s3 + $0x180] sm:$0xff]  ;;  %v184_v22 = vld [vmem:[%s1392_s3 + $0x190] sm:$0xff]  ;;  %v187_v23 = vld [vmem:[%s1392_s3 + $0x1a8] sm:$0xff] }
  0x15   :  { %v189_v24 = vld [vmem:[%s1392_s3 + $0x1b8] sm:$0xff]  ;;  %v716_v25 = vpack.c.bf16 %v184_v22, %v182_v21  ;;  %v186_v27 = vld [vmem:[%s1392_s3 + $0x1a0] sm:$0xff]  ;;  %v188_v28 = vld [vmem:[%s1392_s3 + $0x1b0] sm:$0xff] }
  0x16   :  { %v718_v26 = vpack.c.bf16 %v189_v24, %v187_v23  ;;  %v191_v29 = vld [vmem:[%s1392_s3 + $0x1c8] sm:$0xff]  ;;  %v193_v30 = vld [vmem:[%s1392_s3 + $0x1d8] sm:$0xff]  ;;  %v720_v31 = vpack.c.bf16 %v188_v28, %v186_v27  ;;  %v190_v33 = vld [vmem:[%s1392_s3 + $0x1c0] sm:$0xff] }
  0x17   :  { %685 = vmatpush1.bf16.msra.mxu1 %v684_v41  ;;  %v722_v32 = vpack.c.bf16 %v193_v30, %v191_v29  ;;  %v192_v34 = vld [vmem:[%s1392_s3 + $0x1d0] sm:$0xff]  ;;  %v195_v36 = vld [vmem:[%s1392_s3 + $0x1e8] sm:$0xff]  ;;  %v197_v37 = vld [vmem:[%s1392_s3 + $0x1f8] sm:$0xff] }
  0x18   :  { %687 = vmatprep.subr.bf16.mxu1 %v686_v42  ;;  %v724_v35 = vpack.c.bf16 %v192_v34, %v190_v33  ;;  %v726_v38 = vpack.c.bf16 %v197_v37, %v195_v36  ;;  %v194_v39 = vld [vmem:[%s1392_s3 + $0x1e0] sm:$0xff]  ;;  %v196_v40 = vld [vmem:[%s1392_s3 + $0x1f0] sm:$0xff]  ;;  %v563_v42 = vld [vmem:[%s1392_s3 + $0x208] sm:$0xff] }
  0x19   :  { %v728_v41 = vpack.c.bf16 %v196_v40, %v194_v39  ;;  %v565_v43 = vld [vmem:[%s1392_s3 + $0x218] sm:$0xff]  ;;  %v562_v44 = vld [vmem:[%s1392_s3 + $0x200] sm:$0xff]  ;;  %v564_v46 = vld [vmem:[%s1392_s3 + $0x210] sm:$0xff] }
  0x1a   :  { %v730_v45 = vpack.c.bf16 %v565_v43, %v563_v42  ;;  %v732_v49 = vpack.c.bf16 %v564_v46, %v562_v44  ;;  %v566_v51 = vld [vmem:[%s1392_s3 + $0x220] sm:$0xff]  ;;  %v568_v52 = vld [vmem:[%s1392_s3 + $0x230] sm:$0xff]  ;;  %v603_v37 = vld [vmem:[%s1392_s3 + $0x348] sm:$0xff] }
  0x1b   :  { %689 = vmatpush1.bf16.msra.mxu1 %v688_v47  ;;  %v567_v47 = vld [vmem:[%s1392_s3 + $0x228] sm:$0xff]  ;;  %v736_v55 = vpack.c.bf16 %v568_v52, %v566_v51  ;;  %v570_v57 = vld [vmem:[%s1392_s3 + $0x240] sm:$0xff]  ;;  %v572_v58 = vld [vmem:[%s1392_s3 + $0x250] sm:$0xff] }
  0x1c   :  { %691 = vmatprep.subr.bf16.mxu1 %v690_v48  ;;  %v569_v48 = vld [vmem:[%s1392_s3 + $0x238] sm:$0xff]  ;;  %731 = vmatprep.subr.bf16.mxu0 %v730_v45  ;;  %v740_v61 = vpack.c.bf16 %v572_v58, %v570_v57  ;;  %v574_v63 = vld [vmem:[%s1392_s3 + $0x260] sm:$0xff]  ;;  %v576_v0 = vld [vmem:[%s1392_s3 + $0x270] sm:$0xff] }
  0x1d   :  { %v734_v50 = vpack.c.bf16 %v569_v48, %v567_v47  ;;  %733 = vmatpush1.bf16.msra.mxu0 %v732_v49  ;;  %v744_v3 = vpack.c.bf16 %v576_v0, %v574_v63  ;;  %v578_v5 = vld [vmem:[%s1392_s3 + $0x280] sm:$0xff]  ;;  %v580_v6 = vld [vmem:[%s1392_s3 + $0x290] sm:$0xff]  ;;  %v607_v43 = vld [vmem:[%s1392_s3 + $0x368] sm:$0xff] }
  0x1e   :  { %v748_v9 = vpack.c.bf16 %v580_v6, %v578_v5  ;;  %v582_v11 = vld [vmem:[%s1392_s3 + $0x2a0] sm:$0xff]  ;;  %v584_v12 = vld [vmem:[%s1392_s3 + $0x2b0] sm:$0xff]  ;;  %v609_v44 = vld [vmem:[%s1392_s3 + $0x378] sm:$0xff] }
  0x1f   :  { %693 = vmatpush1.bf16.msra.mxu1 %v692_v53  ;;  %v571_v53 = vld [vmem:[%s1392_s3 + $0x248] sm:$0xff]  ;;  %735 = vmatprep.subr.bf16.mxu0 %v734_v50  ;;  %v752_v15 = vpack.c.bf16 %v584_v12, %v582_v11  ;;  %v586_v17 = vld [vmem:[%s1392_s3 + $0x2c0] sm:$0xff]  ;;  %v588_v18 = vld [vmem:[%s1392_s3 + $0x2d0] sm:$0xff]  ;;  %v774_v46 = vpack.c.bf16 %v609_v44, %v607_v43 }
  0x20   :  { %695 = vmatprep.subr.bf16.mxu1 %v694_v54  ;;  %v573_v54 = vld [vmem:[%s1392_s3 + $0x258] sm:$0xff]  ;;  %v756_v21 = vpack.c.bf16 %v588_v18, %v586_v17  ;;  %v590_v23 = vld [vmem:[%s1392_s3 + $0x2e0] sm:$0xff]  ;;  %v592_v24 = vld [vmem:[%s1392_s3 + $0x2f0] sm:$0xff] }
  0x21   :  { %v738_v56 = vpack.c.bf16 %v573_v54, %v571_v53  ;;  %737 = vmatpush1.bf16.msra.mxu0 %v736_v55  ;;  %v760_v27 = vpack.c.bf16 %v592_v24, %v590_v23  ;;  %v594_v29 = vld [vmem:[%s1392_s3 + $0x300] sm:$0xff]  ;;  %v596_v30 = vld [vmem:[%s1392_s3 + $0x310] sm:$0xff]  ;;  %v611_v49 = vld [vmem:[%s1392_s3 + $0x388] sm:$0xff] }
  0x22   :  { %v764_v33 = vpack.c.bf16 %v596_v30, %v594_v29  ;;  %v600_v36 = vld [vmem:[%s1392_s3 + $0x330] sm:$0xff]  ;;  %v606_v47 = vld [vmem:[%s1392_s3 + $0x360] sm:$0xff]  ;;  %v613_v50 = vld [vmem:[%s1392_s3 + $0x398] sm:$0xff] }
  0x23   :  { %697 = vmatpush1.bf16.msra.mxu1 %v696_v59  ;;  %v575_v59 = vld [vmem:[%s1392_s3 + $0x268] sm:$0xff]  ;;  %739 = vmatprep.subr.bf16.mxu0 %v738_v56  ;;  %v604_v42 = vld [vmem:[%s1392_s3 + $0x350] sm:$0xff]  ;;  %v778_v52 = vpack.c.bf16 %v613_v50, %v611_v49  ;;  %v610_v53 = vld [vmem:[%s1392_s3 + $0x380] sm:$0xff] }
  0x24   :  { %699 = vmatprep.subr.bf16.mxu1 %v698_v60  ;;  %v577_v60 = vld [vmem:[%s1392_s3 + $0x278] sm:$0xff]  ;;  %v608_v48 = vld [vmem:[%s1392_s3 + $0x370] sm:$0xff]  ;;  %v615_v55 = vld [vmem:[%s1392_s3 + $0x3a8] sm:$0xff] }
  0x25   :  { %v742_v62 = vpack.c.bf16 %v577_v60, %v575_v59  ;;  %741 = vmatpush1.bf16.msra.mxu0 %v740_v61  ;;  %v776_v51 = vpack.c.bf16 %v608_v48, %v606_v47  ;;  %v612_v54 = vld [vmem:[%s1392_s3 + $0x390] sm:$0xff]  ;;  %v617_v56 = vld [vmem:[%s1392_s3 + $0x3b8] sm:$0xff]  ;;  %v614_v59 = vld [vmem:[%s1392_s3 + $0x3a0] sm:$0xff] }
  0x26   :  { %v780_v57 = vpack.c.bf16 %v612_v54, %v610_v53  ;;  %v782_v58 = vpack.c.bf16 %v617_v56, %v615_v55  ;;  %v616_v60 = vld [vmem:[%s1392_s3 + $0x3b0] sm:$0xff]  ;;  %v619_v61 = vld [vmem:[%s1392_s3 + $0x3c8] sm:$0xff]  ;;  %v468_v43 = vld [vmem:[%s1395_s4 + $0xb8] sm:$0xff] }
  0x27   :  { %701 = vmatpush1.bf16.msra.mxu1 %v700_v1  ;;  %v579_v1 = vld [vmem:[%s1392_s3 + $0x288] sm:$0xff]  ;;  %743 = vmatprep.subr.bf16.mxu0 %v742_v62  ;;  %v621_v62 = vld [vmem:[%s1392_s3 + $0x3d8] sm:$0xff]  ;;  %v784_v63 = vpack.c.bf16 %v616_v60, %v614_v59  ;;  %v620_v17 = vld [vmem:[%s1392_s3 + $0x3d0] sm:$0xff] }
  0x28   :  { %703 = vmatprep.subr.bf16.mxu1 %v702_v2  ;;  %v581_v2 = vld [vmem:[%s1392_s3 + $0x298] sm:$0xff]  ;;  %v786_v0 = vpack.c.bf16 %v621_v62, %v619_v61  ;;  %v624_v23 = vld [vmem:[%s1392_s3 + $0x3f0] sm:$0xff]  ;;  %v446_v29 = vld [vmem:[%s1395_s4 + $0x8] sm:$0xff] }
  0x29   :  { %v746_v4 = vpack.c.bf16 %v581_v2, %v579_v1  ;;  %745 = vmatpush1.bf16.msra.mxu0 %v744_v3  ;;  %v32_v1 = vlaneseq  ;;  %v463_v30 = vld [vmem:[%s1395_s4 + $0x90] sm:$0xff]  ;;  %v452_v47 = vld [vmem:[%s1395_s4 + $0x38] sm:$0xff]  ;;  %v469_v48 = vld [vmem:[%s1395_s4 + $0xc0] sm:$0xff] }
  0x2a   :  { %v470_v49 = vld [vmem:[%s1395_s4 + $0xc8] sm:$0xff]  ;;  %v471_v54 = vld [vmem:[%s1395_s4 + $0xd0] sm:$0xff]  ;;  %v472_v55 = vld [vmem:[%s1395_s4 + $0xd8] sm:$0xff] }
  0x2b   :  { %705 = vmatpush1.bf16.msra.mxu1 %v704_v7  ;;  %v583_v7 = vld [vmem:[%s1392_s3 + $0x2a8] sm:$0xff]  ;;  %747 = vmatprep.subr.bf16.mxu0 %v746_v4  ;;  %v1252_v2 = vshrl.u32 %v32_v1, 7  ;;  %v1258_v4 = vld [vmem:[%s1394_s2] sm:$0x77]  ;;  %v456_v59 = vld [vmem:[%s1395_s4 + $0x58] sm:$0xff] }
  0x2c   :  { %707 = vmatprep.subr.bf16.mxu1 %v706_v8  ;;  %v585_v8 = vld [vmem:[%s1392_s3 + $0x2b8] sm:$0xff]  ;;  %v454_v53 = vld [vmem:[%s1395_s4 + $0x48] sm:$0xff]  ;;  %v473_v60 = vld [vmem:[%s1395_s4 + $0xe0] sm:$0xff] }
  0x2d   :  { %v750_v10 = vpack.c.bf16 %v585_v8, %v583_v7  ;;  %749 = vmatpush1.bf16.msra.mxu0 %v748_v9  ;;  %v34_v3 = vsub.s32 0, %v1252_v2  ;;  %v38_v5 = vsub.s32 4, %v1252_v2  ;;  %v474_v61 = vld [vmem:[%s1395_s4 + $0xe8] sm:$0xff]  ;;  %v204_v1 = vsub.s32 5, %v1252_v2 }
  0x2f   :  { %709 = vmatpush1.bf16.msra.mxu1 %v708_v13  ;;  %v587_v13 = vld [vmem:[%s1392_s3 + $0x2c8] sm:$0xff]  ;;  %751 = vmatprep.subr.bf16.mxu0 %v750_v10  ;;  %v35_v6 = vrot.slane %v1258_v4, %v34_v3  ;;  %v39_v7 = vrot.slane %v1258_v4, %v38_v5  ;;  %v205_v5 = vrot.slane %v1258_v4, %v204_v1 }
  0x30   :  { %711 = vmatprep.subr.bf16.mxu1 %v710_v14  ;;  %v589_v14 = vld [vmem:[%s1392_s3 + $0x2d8] sm:$0xff] }
  0x31   :  { %v754_v16 = vpack.c.bf16 %v589_v14, %v587_v13  ;;  %753 = vmatpush1.bf16.msra.mxu0 %v752_v15  ;;  %v45_v8 = vrot.slane %v35_v6, %v34_v3  ;;  %v49_v9 = vrot.slane %v39_v7, %v34_v3 }
  0x33   :  { %713 = vmatpush1.bf16.msra.mxu1 %v712_v19  ;;  %v591_v19 = vld [vmem:[%s1392_s3 + $0x2e8] sm:$0xff]  ;;  %755 = vmatprep.subr.bf16.mxu0 %v754_v16  ;;  %v618_v16 = vld [vmem:[%s1392_s3 + $0x3c0] sm:$0xff] }
  0x34   :  { %715 = vmatprep.subr.bf16.mxu1 %v714_v20  ;;  %v593_v20 = vld [vmem:[%s1392_s3 + $0x2f8] sm:$0xff]  ;;  %v788_v18 = vpack.c.bf16 %v620_v17, %v618_v16  ;;  %v475_v17 = vld [vmem:[%s1395_s4 + $0xf0] sm:$0xff] }
  0x35   :  { %v758_v22 = vpack.c.bf16 %v593_v20, %v591_v19  ;;  %757 = vmatpush1.bf16.msra.mxu0 %v756_v21  ;;  %v623_v19 = vld [vmem:[%s1392_s3 + $0x3e8] sm:$0xff]  ;;  %v625_v20 = vld [vmem:[%s1392_s3 + $0x3f8] sm:$0xff] }
  0x36   :  { %v790_v21 = vpack.c.bf16 %v625_v20, %v623_v19  ;;  %v459_v20 = vld [vmem:[%s1395_s4 + $0x70] sm:$0xff] }
  0x37   :  { %717 = vmatpush1.bf16.msra.mxu1 %v716_v25  ;;  %v595_v25 = vld [vmem:[%s1392_s3 + $0x308] sm:$0xff]  ;;  %759 = vmatprep.subr.bf16.mxu0 %v758_v22  ;;  %v622_v22 = vld [vmem:[%s1392_s3 + $0x3e0] sm:$0xff] }
  0x38   :  { %719 = vmatprep.subr.bf16.mxu1 %v718_v26  ;;  %v597_v26 = vld [vmem:[%s1392_s3 + $0x318] sm:$0xff]  ;;  %v792_v24 = vpack.c.bf16 %v624_v23, %v622_v22  ;;  %v356_v23 = vsub.s32 2, %v1252_v2 }
  0x39   :  { %v762_v28 = vpack.c.bf16 %v597_v26, %v595_v25  ;;  %761 = vmatpush1.bf16.msra.mxu0 %v760_v27  ;;  %v461_v25 = vld [vmem:[%s1395_s4 + $0x80] sm:$0xff]  ;;  %v462_v26 = vld [vmem:[%s1395_s4 + $0x88] sm:$0xff] }
  0x3a   :  { %v445_v27 = vld [vmem:[%s1395_s4] sm:$0xff] }
  0x3b   :  { %721 = vmatpush1.bf16.msra.mxu1 %v720_v31  ;;  %v599_v31 = vld [vmem:[%s1392_s3 + $0x328] sm:$0xff]  ;;  %763 = vmatprep.subr.bf16.mxu0 %v762_v28  ;;  %v794_v28 = vpack.c.bf16 %v462_v26, %v461_v25  ;;  %v357_v25 = vrot.slane %v1258_v4, %v356_v23 }
  0x3c   :  { %723 = vmatprep.subr.bf16.mxu1 %v722_v32  ;;  %v601_v32 = vld [vmem:[%s1392_s3 + $0x338] sm:$0xff] }
  0x3d   :  { %v766_v34 = vpack.c.bf16 %v601_v32, %v599_v31  ;;  %765 = vmatpush1.bf16.msra.mxu0 %v764_v33  ;;  %v464_v31 = vld [vmem:[%s1395_s4 + $0x98] sm:$0xff]  ;;  %v796_v32 = vpack.c.bf16 %v446_v29, %v445_v27  ;;  %v367_v27 = vrot.slane %v357_v25, %v356_v23 }
  0x3e   :  { %v798_v33 = vpack.c.bf16 %v464_v31, %v463_v30 }
  0x3f   :  { %725 = vmatpush1.bf16.msra.mxu1 %v724_v35  ;;  %v598_v35 = vld [vmem:[%s1392_s3 + $0x320] sm:$0xff]  ;;  %767 = vmatprep.subr.bf16.mxu0 %v766_v34  ;;  %v447_v34 = vld [vmem:[%s1395_s4 + $0x10] sm:$0xff] }
  0x40   :  { %727 = vmatprep.subr.bf16.mxu1 %v726_v38  ;;  %v605_v38 = vld [vmem:[%s1392_s3 + $0x358] sm:$0xff]  ;;  %v768_v39 = vpack.c.bf16 %v600_v36, %v598_v35  ;;  %v465_v36 = vld [vmem:[%s1395_s4 + $0xa0] sm:$0xff] }
  0x41   :  { %v770_v40 = vpack.c.bf16 %v605_v38, %v603_v37  ;;  %v448_v35 = vld [vmem:[%s1395_s4 + $0x18] sm:$0xff]  ;;  %v466_v37 = vld [vmem:[%s1395_s4 + $0xa8] sm:$0xff] }
  0x42   :  { %769 = vmatpush1.bf16.msra.mxu0 %v768_v39  ;;  %v800_v38 = vpack.c.bf16 %v448_v35, %v447_v34  ;;  %v802_v39 = vpack.c.bf16 %v466_v37, %v465_v36  ;;  %v626_v36 = vld [vmem:[%s1396_s5] ss:$0 sm:$0xff] }
  0x43   :  { %729 = vmatpush1.bf16.msra.mxu1 %v728_v41  ;;  %v602_v41 = vld [vmem:[%s1392_s3 + $0x340] sm:$0xff]  ;;  %771 = vmatprep.subr.bf16.mxu0 %v770_v40 }
  0x44   :  { %v772_v45 = vpack.c.bf16 %v604_v42, %v602_v41  ;;  %795 = vmatprep.subr.bf16.mxu1 %v794_v28  ;;  %v449_v40 = vld [vmem:[%s1395_s4 + $0x20] sm:$0xff]  ;;  %v450_v41 = vld [vmem:[%s1395_s4 + $0x28] sm:$0xff]  ;;  %v467_v42 = vld [vmem:[%s1395_s4 + $0xb0] sm:$0xff] }
  0x45   :  { %v804_v44 = vpack.c.bf16 %v450_v41, %v449_v40 }
  0x46   :  { %773 = vmatpush1.bf16.msra.mxu0 %v772_v45  ;;  %v806_v45 = vpack.c.bf16 %v468_v43, %v467_v42 }
  0x47   :  { %775 = vmatprep.subr.bf16.mxu0 %v774_v46  ;;  %v451_v46 = vld [vmem:[%s1395_s4 + $0x30] sm:$0xff] }
  0x48   :  { %v808_v50 = vpack.c.bf16 %v452_v47, %v451_v46 }
  0x4a   :  { %777 = vmatpush1.bf16.msra.mxu0 %v776_v51  ;;  %v810_v51 = vpack.c.bf16 %v470_v49, %v469_v48 }
  0x4b   :  { %779 = vmatprep.subr.bf16.mxu0 %v778_v52  ;;  %v453_v52 = vld [vmem:[%s1395_s4 + $0x40] sm:$0xff] }
  0x4c   :  { %v812_v56 = vpack.c.bf16 %v454_v53, %v453_v52 }
  0x4e   :  { %781 = vmatpush1.bf16.msra.mxu0 %v780_v57  ;;  %v814_v57 = vpack.c.bf16 %v472_v55, %v471_v54 }
  0x4f   :  { %783 = vmatprep.subr.bf16.mxu0 %v782_v58  ;;  %v455_v58 = vld [vmem:[%s1395_s4 + $0x50] sm:$0xff] }
  0x50   :  { %v816_v62 = vpack.c.bf16 %v456_v59, %v455_v58 }
  0x52   :  { %785 = vmatpush1.bf16.msra.mxu0 %v784_v63  ;;  %v818_v63 = vpack.c.bf16 %v474_v61, %v473_v60 }
  0x53   :  { %787 = vmatprep.subr.bf16.mxu0 %v786_v0  ;;  %v200_v0 = vsub.s32 1, %v1252_v2 }
  0x55   :  { %v201_v3 = vrot.slane %v1258_v4, %v200_v0  ;;  %v215_v7 = vrot.slane %v205_v5, %v200_v0 }
  0x56   :  { %789 = vmatpush1.bf16.msra.mxu0 %v788_v18  ;;  %v476_v18 = vld [vmem:[%s1395_s4 + $0xf8] sm:$0xff] }
  0x57   :  { %791 = vmatprep.subr.bf16.mxu0 %v790_v21  ;;  %v211_v6 = vrot.slane %v201_v3, %v200_v0  ;;  %v822_v19 = vpack.c.bf16 %v476_v18, %v475_v17  ;;  %v460_v21 = vld [vmem:[%s1395_s4 + $0x78] sm:$0xff] }
  0x58   :  { %v824_v22 = vpack.c.bf16 %v460_v21, %v459_v20 }
  0x5a   :  { %793 = vmatpush1.bf16.msra.mxu0 %v792_v24  ;;  %v360_v24 = vsub.s32 6, %v1252_v2 }
  0x5c   :  { %v361_v26 = vrot.slane %v1258_v4, %v360_v24 }
  0x5e   :  { %v371_v28 = vrot.slane %v361_v26, %v356_v23 }
  0xdd   :  { %v127_v10 = vpop.f32.mrb[0].mxu0 }
  0xde   :  { %v128_v11 = vadd.f32 %v127_v10, %v45_v8  ;;  %v129_v12 = vpop.f32.mrb[1].mxu0 }
  0xdf   :  { %v130_v13 = vadd.f32 %v129_v12, %v49_v9 }
  0xe0   :  { %v132_v15 = vmax.f32 %v128_v11, 0.0 }
  0xe1   :  { %v133_v14 = vmax.f32 %v130_v13, 0.0 }
  0xe3   :  { %280 = vmatprep.mubr.f32.mxu1 %v133_v14  ;;  %v457_v14 = vld [vmem:[%s1395_s4 + $0x60] sm:$0xff] }
  0xe4   :  { %281 = vmatmul.mubr.f32.vlgmr.msra.gmra.mrb[0].mxu1 %v132_v15  ;;  %v458_v15 = vld [vmem:[%s1395_s4 + $0x68] sm:$0xff] }
  0xe5   :  { %797 = vmatpush3.bf16.msra.mxu1 %v796_v32  ;;  %v820_v16 = vpack.c.bf16 %v458_v15, %v457_v14 }
  0xe6   :  { %799 = vmatprep.subr.bf16.mxu1 %v798_v33 }
  0xe9   :  { %801 = vmatpush3.bf16.msra.mxu1 %v800_v38 }
  0xea   :  { %803 = vmatprep.subr.bf16.mxu1 %v802_v39 }
  0xed   :  { %805 = vmatpush3.bf16.msra.mxu1 %v804_v44 }
  0xee   :  { %807 = vmatprep.subr.bf16.mxu1 %v806_v45 }
  0xf1   :  { %809 = vmatpush3.bf16.msra.mxu1 %v808_v50 }
  0xf2   :  { %811 = vmatprep.subr.bf16.mxu1 %v810_v51 }
  0xf5   :  { %813 = vmatpush3.bf16.msra.mxu1 %v812_v56 }
  0xf6   :  { %815 = vmatprep.subr.bf16.mxu1 %v814_v57 }
  0xf9   :  { %817 = vmatpush3.bf16.msra.mxu1 %v816_v62 }
  0xfa   :  { %819 = vmatprep.subr.bf16.mxu1 %v818_v63 }
  0xfd   :  { %821 = vmatpush3.bf16.msra.mxu1 %v820_v16 }
  0xfe   :  { %823 = vmatprep.subr.bf16.mxu1 %v822_v19 }
 0x101   :  { %825 = vmatpush3.bf16.msra.mxu1 %v824_v22 }
 0x1b7   :  { %v282_v8 = vpop.f32.mrb[0].mxu1 }
 0x1b8   :  { %v283_v9 = vadd.f32 %v282_v8, %v211_v6  ;;  %v284_v10 = vpop.f32.mrb[1].mxu1 }
 0x1b9   :  { %v285_v11 = vadd.f32 %v284_v10, %v215_v7 }
 0x1ba   :  { %v287_v13 = vmax.f32 %v283_v9, 0.0 }
 0x1bb   :  { %v288_v12 = vmax.f32 %v285_v11, 0.0 }
 0x1bd   :  { %436 = vmatprep.mubr.f32.mxu0 %v288_v12 }
 0x1be   :  { %437 = vmatmul.mubr.f32.vlgmr.msra.gmra.mrb[2].mxu0 %v287_v13 }
 0x291   :  { %v438_v29 = vpop.f32.mrb[2].mxu0 }
 0x292   :  { %v439_v30 = vadd.f32 %v438_v29, %v367_v27  ;;  %v440_v31 = vpop.f32.mrb[3].mxu0 }
 0x293   :  { %v441_v32 = vadd.f32 %v440_v31, %v371_v28 }
 0x294   :  { %v443_v34 = vmax.f32 %v439_v30, 0.0 }
 0x295   :  { %v444_v33 = vmax.f32 %v441_v32, 0.0 }
 0x297   :  { %548 = vmatprep.mubr.f32.mxu1 %v444_v33 }
 0x298   :  { %549 = vmatmul.mubr.f32.vlgmr.msra.gmra.mrb[2].mxu1 %v443_v34 }
 0x36b   :  { %v659_v35 = vpop.f32.mrb[2].mxu1 }
 0x36c   :  { %v660_v2 = vpop.f32.mrb[3].mxu1 }
 0x36d   :  { %v661_v37 = vadd.f32 %v660_v2, %v659_v35 }
 0x36f   :  { %v551_v38 = vadd.f32 %v661_v37, %v626_v36 }
 0x371   :  { %554 = vst [vmem:[%s1397_s6] sm:$0xff] %v551_v38 }

</bundles_post_ra>
